<compile_context>
chip_gen: v5e
topology: v5e:2x2
jax: 0.10.0
libtpu: 0.0.40
codegen_flags: <defaults>
</compile_context>

<pallas_src>
import math
import numpy as np
import jax
import jax.numpy as jnp
from jax.experimental import pallas as pl
from jax.experimental.pallas import tpu as pltpu


# -------------------- deterministic DCT filter (mirrors the PyTorch code) --------------------
def get_freq_indices(method):
    assert method.startswith("top")
    num_freq = int(method[3:])
    all_top_indices_x = [0, 0, 6, 0, 0, 1, 1, 4, 5, 1, 3, 0, 0, 0, 3, 2,
                         4, 6, 3, 5, 5, 2, 6, 5, 5, 3, 3, 4, 2, 2, 6, 1]
    all_top_indices_y = [0, 1, 0, 5, 2, 0, 2, 0, 0, 6, 0, 4, 6, 3, 5, 2,
                         6, 3, 3, 3, 5, 1, 1, 2, 4, 2, 1, 1, 3, 0, 5, 3]
    return all_top_indices_x[:num_freq], all_top_indices_y[:num_freq]


def _build_filter(pos, freq, POS):
    result = math.cos(math.pi * freq * (pos + 0.5) / POS) / math.sqrt(POS)
    return result if freq == 0 else result * math.sqrt(2)


def get_dct_filter(tile_x, tile_y, mapper_x, mapper_y, channel):
    """Same construction as MultiSpectralDCTLayer.get_dct_filter -> (C, H, W) float32."""
    assert len(mapper_x) == len(mapper_y)
    assert channel % len(mapper_x) == 0
    dct = np.zeros((channel, tile_x, tile_y), dtype=np.float32)
    c_part = channel // len(mapper_x)
    for i, (u_x, v_y) in enumerate(zip(mapper_x, mapper_y)):
        for t_x in range(tile_x):
            for t_y in range(tile_y):
                dct[i * c_part:(i + 1) * c_part, t_x, t_y] = (
                    _build_filter(t_x, u_x, tile_x) * _build_filter(t_y, v_y, tile_y)
                )
    return dct


# -------------------- Pallas kernel --------------------
def dct_pool_kernel(x_ref, w_ref, out_ref):
    """DCT-weighted spatial pooling for a batch tile of samples.

    x_ref:   (NB, C, HW)  NB samples, spatial flattened onto the lane axis
    w_ref:   (C, HW)      DCT filter (VMEM-resident across all grid steps)
    out_ref: (NB, C)      per-channel pooled result (lane-dense)
    """
    x = x_ref[...].astype(jnp.float32)          # upcast (no-op for f32 inputs) -> VPU
    xw = x * w_ref[...][None, :, :]             # VPU elementwise, (NB, C, HW)
    out_ref[...] = jnp.sum(xw, axis=-1)         # XLU lane reduction -> (NB, C)


# -------------------- tiling heuristics --------------------
def _choose_block_n(N, C, HW, target_bytes=2 << 20, min_steps=2):
    """Pick NB so one x tile is ~target_bytes of f32, keeping >= min_steps grid steps
    when possible and NB either a multiple of 8 (sublane-aligned output) or == N."""
    per_sample = C * HW * 4
    nb = max(1, target_bytes // per_sample)
    if N >= 2 * 8:
        nb = min(nb, max(8, N // min_steps))    # keep the pipeline / both v7x TCs fed
        nb = max(8, (nb // 8) * 8)              # sublane-aligned second-minor out dim
    else:
        nb = N                                   # single full block (block dim == array dim)
    return int(nb)


# -------------------- wrapper --------------------
def multispectral_dct_forward(x_nchw, dct_weight):
    """Equivalent of MultiSpectralDCTLayer.forward: (N,C,H,W) -> (N,C)."""
    assert x_nchw.ndim == 4, "x must be 4 dimensions"
    N, C, H, W = x_nchw.shape
    assert dct_weight.shape == (C, H, W), \
        "x channel/spatial dims must match the DCT filter"
    HW = H * W

    # Contiguous reshapes only (free, no data movement / no extra HBM passes).
    x_flat = x_nchw.reshape(N, C, HW)
    w_flat = dct_weight.reshape(C, HW).astype(jnp.float32)

    NB = _choose_block_n(N, C, HW)
    n_blocks = pl.cdiv(N, NB)
    N_pad = n_blocks * NB
    if N_pad != N:
        # Ragged tail: pad batch with zeros (padded rows produce zeros, sliced off below).
        x_flat = jnp.pad(x_flat, ((0, N_pad - N), (0, 0), (0, 0)))

    # VMEM budget: double-buffered x tile + resident (double-buffered) weight + out tile.
    x_tile_bytes = NB * C * HW * 4
    w_bytes = C * HW * 4
    out_tile_bytes = NB * C * 4
    needed = 2 * x_tile_bytes + 2 * w_bytes + 2 * out_tile_bytes
    vmem_limit = min(max(2 * needed + (4 << 20), 32 << 20), 64 << 20)

    out = pl.pallas_call(
        dct_pool_kernel,
        out_shape=jax.ShapeDtypeStruct((N_pad, C), jnp.float32),
        grid=(n_blocks,),
        in_specs=[
            pl.BlockSpec((NB, C, HW), lambda n: (n, 0, 0)),   # NB samples per step
            pl.BlockSpec((C, HW), lambda n: (0, 0)),          # same block every step -> resident
        ],
        out_specs=pl.BlockSpec((NB, C), lambda n: (n, 0)),    # lane-dense output slab
        compiler_params=pltpu.CompilerParams(
            dimension_semantics=("parallel",),
            vmem_limit_bytes=vmem_limit,
        ),
    )(x_flat, w_flat)

    return out[:N] if N_pad != N else out


if __name__ == "__main__":
    # Small, deterministic example matching typical MultiSpectralDCTLayer usage
    # (channel % num_freq == 0; mappers scaled by dct_size // 7 as in Frequence.py).
    N, C, H, W = 16, 32, 16, 16
    mapper_x, mapper_y = get_freq_indices("top16")
    mapper_x = [tx * (H // 7) for tx in mapper_x]
    mapper_y = [ty * (W // 7) for ty in mapper_y]

    dct_weight = jnp.asarray(get_dct_filter(H, W, mapper_x, mapper_y, C))  # (C, H, W)

    key = jax.random.PRNGKey(0)
    x = jax.random.normal(key, (N, C, H, W), jnp.float32)

    out = multispectral_dct_forward(x, dct_weight)
    jax.block_until_ready(out)

    # Pure-JAX reference (same math as the PyTorch forward).
    ref = jnp.sum(x * dct_weight[None], axis=(2, 3))
    assert out.shape == (N, C)
    assert jnp.allclose(out, ref, rtol=1e-4, atol=1e-4)
    print("KERNEL_OK")
</pallas_src>

<mosaic_0001>
module attributes {stable_mosaic.version = 11 : i64} {
  func.func @dct_pool_kernel(%arg0: i32, %arg1: memref<8x32x256xf32, #tpu.memory_space<vmem>>, %arg2: memref<32x256xf32, #tpu.memory_space<vmem>>, %arg3: memref<8x32xf32, #tpu.memory_space<vmem>>) attributes {dimension_semantics = [#tpu.dimension_semantics<parallel>], iteration_bounds = array<i64: 2>, scalar_prefetch = 0 : i64, scratch_operands = 0 : i64, tpu.core_type = #tpu.core_type<tc>, window_params = [{transform_indices = @transform_0, window_bounds = array<i64: 8, 32, 256>}, {pipeline_mode = #tpu.pipeline_mode<synchronous>, transform_indices = @transform_1, window_bounds = array<i64: 32, 256>}, {transform_indices = @transform_2, window_bounds = array<i64: 8, 32>}]} {
    %c0 = arith.constant 0 : index
    %c0_0 = arith.constant 0 : index
    %c0_1 = arith.constant 0 : index
    %0 = vector.load %arg1[%c0, %c0_0, %c0_1] : memref<8x32x256xf32, #tpu.memory_space<vmem>>, vector<8x32x256xf32>
    %c0_2 = arith.constant 0 : index
    %c0_3 = arith.constant 0 : index
    %1 = vector.load %arg2[%c0_2, %c0_3] : memref<32x256xf32, #tpu.memory_space<vmem>>, vector<32x256xf32>
    %2 = vector.shape_cast %1 : vector<32x256xf32> to vector<1x32x256xf32>
    %3 = vector.broadcast %2 : vector<1x32x256xf32> to vector<8x32x256xf32>
    %4 = arith.mulf %0, %3 : vector<8x32x256xf32>
    %cst = arith.constant dense<0.000000e+00> : vector<8x32xf32>
    %5 = vector.multi_reduction <add>, %4, %cst [2] : vector<8x32x256xf32> to vector<8x32xf32>
    %c0_4 = arith.constant 0 : index
    %c0_5 = arith.constant 0 : index
    %6 = vector.load %arg3[%c0_4, %c0_5] : memref<8x32xf32, #tpu.memory_space<vmem>>, vector<8x32xf32>
    tpu.vector_store %arg3[%c0_4, %c0_5], %5 {strides = array<i32>} : memref<8x32xf32, #tpu.memory_space<vmem>>, vector<8x32xf32>,
    return
  }
  func.func @transform_0(%arg0: i32) -> (i32, i32, i32) {
    %c0_i32 = arith.constant 0 : i32
    %c0_i32_0 = arith.constant 0 : i32
    %c0_i32_1 = arith.constant 0 : i32
    return %arg0, %c0_i32, %c0_i32_0 : i32, i32, i32
  }
  func.func @transform_1(%arg0: i32) -> (i32, i32) {
    %c0_i32 = arith.constant 0 : i32
    %c0_i32_0 = arith.constant 0 : i32
    %c0_i32_1 = arith.constant 0 : i32
    return %c0_i32, %c0_i32_0 : i32, i32
  }
  func.func @transform_2(%arg0: i32) -> (i32, i32) {
    %c0_i32 = arith.constant 0 : i32
    %c0_i32_0 = arith.constant 0 : i32
    return %arg0, %c0_i32 : i32, i32
  }
}

</mosaic_0001>

<bundles_post_ra>
// kernel: tpu_custom_call.1
= control target key start
LH: loop header
LB: loop body
LE: loop exit
PB: predicated region body
PF: predicated region fallthrough
CT: control target
= control target key end

     0   :  { %7 = vsyncpa [#allocation3], 0  ;;  %s1214_s0 = inlined_call_operand.hbm [shape: f32[16,32,256], index: 0, kind: input, shape index: {}]   ;;  %s1215_s1 = inlined_call_operand.hbm [shape: f32[32,256], index: 1, kind: input, shape index: {}]   ;;  %s1216_s2 = inlined_call_operand.hbm [shape: f32[16,32], index: 2, kind: output, shape index: {}]  }
   0x1   :  { %9 = vsyncpa [#allocation3 + $0x1], 0 }
   0x2   :  { %10 = vsyncpa [#allocation6], 0 }
   0x3   :  { %11 = vsyncpa [#allocation4], 0 }
   0x4   :  { %13 = vsyncpa [#allocation4 + $0x1], 0  ;;  %s851_s9 = smov 0   ;;  %s853_s10 = smov 0  }
   0x5   :  { %s855_s11 = smov 0   ;;  %s857_s12 = smov 0  }
   0x6 LB: > { %s872_s13 = sadd.s32 4294967295, %s831_s12   ;;  %s624_s14 = sadd.s32 4294967294, %s831_s12   ;;  %s831_s12 = sphi %s857_s12, %s1226_s12   ;;  %s827_s11 = sphi %s855_s11, %s1225_s11   ;;  %s823_s10 = sphi %s853_s10, %s1224_s10   ;;  %s819_s9 = sphi %s851_s9, %s1223_s9  }
   0x7   : > { %p39_p0 = scmp.ne.s32.totalorder %s823_s10, %s819_s9  ;;  %p40_p1 = scmp.eq.s32.totalorder %s872_s13, 0 }
   0x8   : > { %p84_p2 = scmp.eq.s32.totalorder %s872_s13, 1  ;;  %p90_p3 = scmp.eq.s32.totalorder %s624_s14, 1 }
   0x9   : > { %p881_p4 = por %p40_p1, %p39_p0  ;;  %p625_p5 = scmp.ge.s32.totalorder %s831_s12, 1 }
   0xa   : > { %p886_p6 = por %p90_p3, %p39_p0  ;;  %p97_p7 = scmp.lt.s32.totalorder %s831_s12, 3 }
   0xb   : > { %s108_s19 = sshll.u32 %s1215_s1, 4  ;;  %s833_s21 = smov [#allocation5]   ;;  %s109_s19 = int_to_ptr.hbm [resolvable:$true] %s108_s19 }
   0xc   : > { %p894_p8 = pnand %p625_p5, %p97_p7  ;;  %s110_s22 = sshll.u32 %s833_s21, 4  ;;  %s111_s22 = int_to_ptr.vmem [resolvable:$true] %s110_s22 }
   0xd   : > { %s904_s23 = sadd.s32 1, %s831_s12   ;;  %s834_s24 = smov 256  }
   0xe   : > { %p650_p9 = pneg %p894_p8  ;;  %s835_s25 = smov 16  }
   0xf   : > { %s23_s26 = ssub.s32 %s831_s12, %s904_s23  ;;  %s26_s27 = sadd.s32 1, %s827_s11 }
  0x10   : > { %p651_p10 = pnand %p650_p9, %p40_p1  ;;  %p24_p12 = scmp.eq.s32.totalorder %s23_s26, 0 }
  0x11   : > { %p33_p13 = scmp.ne.s32.totalorder %s827_s11, %s823_s10  ;;  %p34_p0 = scmp.eq.s32.totalorder %s831_s12, 0 }
  0x12   : > { %653 = dma.hbm_to_vmem [thread:$0]  (!%p651_p10), %s109_s19, 1024, %s111_s22, [#allocation6], %s834_s24, %s834_s24, %s835_s25  }
  0x13   : > { %s916_s28 = scalar_select %p24_p12, %s827_s11, %s26_s27  }
  0x14   : > { %p920_p3 = por %p84_p2, %p33_p13  ;;  %p663_p5 = scmp.lt.s32.totalorder %s831_s12, 2 }
  0x15   : > { %s124_s30 = sand.u32 1, %s827_s11   ;;  %s641_s3 = sshll.u32 %s831_s12, 9 }
  0x16   : > { %p35_p7 = por %p34_p0, %p33_p13  ;;  %s628_s4 = sshll.u32 %s124_s30, 9 }
  0x17   : > { %s134_s7 = scalar_lea.hbm %s1214_s0, %s641_s3  ;;  %s128_s14 = scalar_lea.vmem [#allocation2], %s628_s4 }
  0x18   : > { %s135_s8 = sshll.u32 %s134_s7, 4  ;;  %s137_s17 = sshll.u32 %s128_s14, 4  ;;  %s136_s8 = int_to_ptr.hbm [resolvable:$true] %s135_s8  ;;  %s138_s17 = int_to_ptr.vmem [resolvable:$true] %s137_s17 }
  0x19   : > { %p930_p9 = pnand %p663_p5, %p35_p7  ;;  %s125_s19 = scalar_lea.sflag [#allocation3], %s124_s30 }
  0x1a   : > { %s731_s21 = sshra.s32 %s136_s8, 4  ;;  %s738_s3 = scalar_lea.hbm %s1214_s0, 1024  ;;  %s732_s21 = int_to_ptr.hbm [resolvable:$true] %s731_s21 }
  0x1b   : > { %s733_s22 = scalar_lea.hbm %s732_s21, 512  ;;  %p735_p10 = pneg %p930_p9 }
  0x1c   : > { %p734_p2 = scmp.ne.s32.totalorder %s732_s21, %s733_s22  ;;  %p739_p0 = scmp.lt.s32.totalorder %s732_s21, %s1214_s0 }
  0x1d   : > { %p740_p5 = scmp.lt.s32.totalorder %s738_s3, %s733_s22 }
  0x1e   : > { %p736_p12 = pnand %p735_p10, %p734_p2 }
  0x1f   : > { %p741_p7 = por %p740_p5, %p739_p0 }
  0x20   : > { %p737_p13 = pneg %p736_p12 }
  0x22   : > { %p742_p11 = pnand %p741_p7, %p737_p13 }
  0x24   : > { %745 = shalt.err (!%p742_p11)
}
  0x25   : > { %657 = dma.hbm_to_vmem [thread:$0]  (!%p930_p9), %s136_s8, 8192, %s138_s17, %s125_s19, %s834_s24, %s834_s24, %s835_s25  }
  0x26   : > { %149 = sbr.rel (%p894_p8) target bundleno = 259 (0x103), region = 28  ;;  %s950_s30 = sand.u32 (!%p894_p8), 1, %s823_s10  }
  0x27   : > { %s633_s6 = sshll.u32 (!%p894_p8), %s950_s30, 9  ;;  %s152_s7 = scalar_lea.sflag (!%p894_p8), [#allocation3], %s950_s30 }
  0x28   : > { %s954_s14 = scalar_lea.vmem (!%p894_p8), [#allocation2], %s633_s6 }
  0x2b   : > { %806 = dma.done.wait (%p881_p4), %s152_s7, 8192  }
  0x2c   : > { %808 = vsyncadd (%p881_p4), %s152_s7, 4294959104 }
  0x2d   : > { %810 = dma.done.wait (%p40_p1), [#allocation6], 1024  }
  0x2e   : > { %812 = vsyncadd (%p40_p1), [#allocation6], 4294966272  ;;  %v191_v0 = vld [vmem:[%s954_s14 + $0x40] sm:$0xff]  ;;  %v192_v1 = vld [vmem:[%s954_s14 + $0x48] sm:$0xff]  ;;  %vm452_vm0 = vcmask 130112   ;;  %vm456_vm1 = vcmask 195712  }
  0x2f   : > { %v966_v2 = vld [vmem:[#allocation5] sm:$0xff]  ;;  %v968_v3 = vld [vmem:[#allocation5 + $0x8] sm:$0xff]  ;;  %v193_v15 = vld [vmem:[%s954_s14 + $0x50] sm:$0xff]  ;;  %vm460_vm2 = vcmask 261312   ;;  %vm511_vm3 = vcmask 1041409   ;;  %vm513_vm4 = vcmask 1042434  }
  0x30   : > { %v263_v4 = vmul.f32 %v966_v2, %v191_v0  ;;  %v187_v5 = vld [vmem:[%s954_s14 + $0x20] sm:$0xff]  ;;  %v188_v6 = vld [vmem:[%s954_s14 + $0x28] sm:$0xff]  ;;  %v264_v7 = vmul.f32 %v968_v3, %v192_v1  ;;  %v194_v16 = vld [vmem:[%s954_s14 + $0x58] sm:$0xff]  ;;  %vm515_vm5 = vcmask 1043459   ;;  %s635_s15 = sshll.u32 %s950_s30, 3  ;;  %s637_s20 = sshll.u32 %s872_s13, 3 }
  0x31   : > { %v974_v8 = vld [vmem:[#allocation5 + $0x20] sm:$0xff]  ;;  %v976_v9 = vld [vmem:[#allocation5 + $0x28] sm:$0xff]  ;;  %v986_v19 = vld [vmem:[#allocation5 + $0x10] sm:$0xff]  ;;  %s539_s25 = scalar_lea.hbm %s1216_s2, %s637_s20  ;;  %vm517_vm6 = vcmask 1044484   ;;  %vm519_vm7 = vcmask 1045509   ;;  %vm521_vm8 = vcmask 1046534  }
  0x32   : > { %v183_v10 = vld [vmem:[%s954_s14] sm:$0xff]  ;;  %v259_v11 = vmul.f32 %v974_v8, %v187_v5  ;;  %v260_v12 = vmul.f32 %v976_v9, %v188_v6  ;;  %v184_v13 = vld [vmem:[%s954_s14 + $0x8] sm:$0xff]  ;;  %v331_v17 = vadd.f32 %v264_v7, %v263_v4  ;;  %v988_v20 = vld [vmem:[#allocation5 + $0x18] sm:$0xff]  ;;  %v265_v27 = vmul.f32 %v986_v19, %v193_v15  ;;  %s181_s8 = scalar_lea.vmem [#allocation7], %s635_s15  ;;  %s543_s18 = sshll.u32 %s539_s25, 4  ;;  %s544_s18 = int_to_ptr.hbm [resolvable:$true] %s543_s18 }
  0x33   : > { %v255_v14 = vmul.f32 %v966_v2, %v183_v10  ;;  %v256_v18 = vmul.f32 %v968_v3, %v184_v13  ;;  %v189_v21 = vld [vmem:[%s954_s14 + $0x30] sm:$0xff]  ;;  %v190_v23 = vld [vmem:[%s954_s14 + $0x38] sm:$0xff]  ;;  %v266_v28 = vmul.f32 %v988_v20, %v194_v16  ;;  %v199_v37 = vld [vmem:[%s954_s14 + $0x80] sm:$0xff]  ;;  %s541_s17 = sshll.u32 %s181_s8, 4  ;;  %vm523_vm9 = vcmask 1047559   ;;  %s529_s19 = scalar_lea.sflag [#allocation4], %s950_s30  ;;  %s542_s17 = int_to_ptr.vmem [resolvable:$true] %s541_s17 }
  0x34   : > { %v325_v22 = vadd.f32 %v260_v12, %v259_v11  ;;  %v992_v24 = vld [vmem:[#allocation5 + $0x30] sm:$0xff]  ;;  %v994_v25 = vld [vmem:[#allocation5 + $0x38] sm:$0xff]  ;;  %332 = vadd.xlane.f32.xlu2 %v331_v17  ;;  %v200_v38 = vld [vmem:[%s954_s14 + $0x88] sm:$0xff]  ;;  %v271_v44 = vmul.f32 %v966_v2, %v199_v37  ;;  %vm526_vm10 = vcmask 261120   ;;  %s775_s21 = sshra.s32 %s544_s18, 4  ;;  %s781_s3 = scalar_lea.hbm %s1216_s2, 16  ;;  %s776_s21 = int_to_ptr.hbm [resolvable:$true] %s775_s21 }
  0x35   : > { %v319_v26 = vadd.f32 %v256_v18, %v255_v14  ;;  %v185_v29 = vld [vmem:[%s954_s14 + $0x10] sm:$0xff]  ;;  %v186_v30 = vld [vmem:[%s954_s14 + $0x18] sm:$0xff]  ;;  %v261_v31 = vmul.f32 %v992_v24, %v189_v21  ;;  %v262_v32 = vmul.f32 %v994_v25, %v190_v23  ;;  %v334_v35 = vadd.f32 %v266_v28, %v265_v27  ;;  %v195_v42 = vld [vmem:[%s954_s14 + $0x60] sm:$0xff]  ;;  %s777_s22 = scalar_lea.hbm %s776_s21, 8  ;;  %p782_p11 = scmp.lt.s32.totalorder %s776_s21, %s1216_s2 }
  0x36   : > { %326 = vadd.xlane.f32.xlu1 %v325_v22  ;;  %v257_v33 = vmul.f32 %v986_v19, %v185_v29  ;;  %v258_v34 = vmul.f32 %v988_v20, %v186_v30  ;;  %v197_v40 = vld [vmem:[%s954_s14 + $0x70] sm:$0xff]  ;;  %v198_v41 = vld [vmem:[%s954_s14 + $0x78] sm:$0xff]  ;;  %v196_v43 = vld [vmem:[%s954_s14 + $0x68] sm:$0xff]  ;;  %v272_v45 = vmul.f32 %v968_v3, %v200_v38  ;;  %v267_v48 = vmul.f32 %v974_v8, %v195_v42  ;;  %p778_p1 = scmp.ne.s32.totalorder %s776_s21, %s777_s22  ;;  %p783_p9 = scmp.lt.s32.totalorder %s781_s3, %s777_s22 }
  0x37   : > { %320 = vadd.xlane.f32.xlu0 %v319_v26  ;;  %v328_v36 = vadd.f32 %v262_v32, %v261_v31  ;;  %v269_v46 = vmul.f32 %v992_v24, %v197_v40  ;;  %v270_v47 = vmul.f32 %v994_v25, %v198_v41  ;;  %v268_v49 = vmul.f32 %v976_v9, %v196_v43  ;;  %v205_v52 = vld [vmem:[%s954_s14 + $0xb0] sm:$0xff]  ;;  %v206_v53 = vld [vmem:[%s954_s14 + $0xb8] sm:$0xff]  ;;  %v203_v55 = vld [vmem:[%s954_s14 + $0xa0] sm:$0xff] }
  0x38   : > { %v322_v39 = vadd.f32 %v258_v34, %v257_v33  ;;  %v343_v50 = vadd.f32 %v272_v45, %v271_v44  ;;  %v204_v56 = vld [vmem:[%s954_s14 + $0xa8] sm:$0xff]  ;;  %v201_v57 = vld [vmem:[%s954_s14 + $0x90] sm:$0xff]  ;;  %v202_v58 = vld [vmem:[%s954_s14 + $0x98] sm:$0xff]  ;;  %v277_v59 = vmul.f32 %v992_v24, %v205_v52  ;;  %v278_v60 = vmul.f32 %v994_v25, %v206_v53  ;;  %p779_p4 = pnand %p778_p1, %p920_p3  ;;  %p784_p2 = por %p783_p9, %p782_p11 }
  0x39   : > { %v340_v51 = vadd.f32 %v270_v47, %v269_v46  ;;  %v337_v54 = vadd.f32 %v268_v49, %v267_v48  ;;  %v275_v61 = vmul.f32 %v974_v8, %v203_v55  ;;  %v276_v62 = vmul.f32 %v976_v9, %v204_v56  ;;  %v211_v5 = vld [vmem:[%s954_s14 + $0xe0] sm:$0xff]  ;;  %v212_v6 = vld [vmem:[%s954_s14 + $0xe8] sm:$0xff]  ;;  %v209_v10 = vld [vmem:[%s954_s14 + $0xd0] sm:$0xff] }
  0x3a   : > { %v273_v63 = vmul.f32 %v986_v19, %v201_v57  ;;  %v274_v0 = vmul.f32 %v988_v20, %v202_v58  ;;  %v352_v1 = vadd.f32 %v278_v60, %v277_v59  ;;  %v210_v11 = vld [vmem:[%s954_s14 + $0xd8] sm:$0xff]  ;;  %v207_v12 = vld [vmem:[%s954_s14 + $0xc0] sm:$0xff]  ;;  %v208_v13 = vld [vmem:[%s954_s14 + $0xc8] sm:$0xff]  ;;  %v283_v14 = vmul.f32 %v974_v8, %v211_v5  ;;  %p780_p8 = pneg %p779_p4 }
  0x3b   : > { %v349_v4 = vadd.f32 %v276_v62, %v275_v61  ;;  %v284_v15 = vmul.f32 %v976_v9, %v212_v6  ;;  %v281_v16 = vmul.f32 %v986_v19, %v209_v10  ;;  %v282_v17 = vmul.f32 %v988_v20, %v210_v11  ;;  %v217_v26 = vld [vmem:[%s954_s14 + $0x110] sm:$0xff]  ;;  %v218_v27 = vld [vmem:[%s954_s14 + $0x118] sm:$0xff]  ;;  %v215_v29 = vld [vmem:[%s954_s14 + $0x100] sm:$0xff] }
  0x3c   : > { %335 = vadd.xlane.f32.xlu2 %v334_v35  ;;  %v346_v7 = vadd.f32 %v274_v0, %v273_v63  ;;  %v279_v18 = vmul.f32 %v966_v2, %v207_v12  ;;  %v280_v21 = vmul.f32 %v968_v3, %v208_v13  ;;  %v216_v30 = vld [vmem:[%s954_s14 + $0x108] sm:$0xff]  ;;  %v213_v31 = vld [vmem:[%s954_s14 + $0xf0] sm:$0xff]  ;;  %v214_v32 = vld [vmem:[%s954_s14 + $0xf8] sm:$0xff]  ;;  %v289_v33 = vmul.f32 %v986_v19, %v217_v26  ;;  %p785_p10 = pnand %p784_p2, %p780_p8 }
  0x3d   : > { %v361_v22 = vadd.f32 %v284_v15, %v283_v14  ;;  %v358_v23 = vadd.f32 %v282_v17, %v281_v16  ;;  %v290_v34 = vmul.f32 %v988_v20, %v218_v27  ;;  %v287_v35 = vmul.f32 %v966_v2, %v215_v29  ;;  %v225_v40 = vld [vmem:[%s954_s14 + $0x150] sm:$0xff]  ;;  %v226_v41 = vld [vmem:[%s954_s14 + $0x158] sm:$0xff]  ;;  %v239_v45 = vld [vmem:[%s954_s14 + $0x1c0] sm:$0xff] }
  0x3e   : > { %329 = vadd.xlane.f32.xlu1 %v328_v36  ;;  %v355_v28 = vadd.f32 %v280_v21, %v279_v18  ;;  %v288_v36 = vmul.f32 %v968_v3, %v216_v30  ;;  %v285_v37 = vmul.f32 %v992_v24, %v213_v31  ;;  %v286_v38 = vmul.f32 %v994_v25, %v214_v32  ;;  %v241_v43 = vld [vmem:[%s954_s14 + $0x1d0] sm:$0xff]  ;;  %v242_v44 = vld [vmem:[%s954_s14 + $0x1d8] sm:$0xff]  ;;  %v223_v47 = vld [vmem:[%s954_s14 + $0x140] sm:$0xff] }
  0x3f   : > { %323 = vadd.xlane.f32.xlu0 %v322_v39  ;;  %v370_v39 = vadd.f32 %v290_v34, %v289_v33  ;;  %v224_v48 = vld [vmem:[%s954_s14 + $0x148] sm:$0xff]  ;;  %v313_v49 = vmul.f32 %v986_v19, %v241_v43  ;;  %v311_v52 = vmul.f32 %v966_v2, %v239_v45  ;;  %v219_v53 = vld [vmem:[%s954_s14 + $0x120] sm:$0xff]  ;;  %v297_v56 = vmul.f32 %v986_v19, %v225_v40  ;;  %v245_v16 = vld [vmem:[%s954_s14 + $0x1f0] sm:$0xff] }
  0x40   : > { %v367_v42 = vadd.f32 %v288_v36, %v287_v35  ;;  %v364_v46 = vadd.f32 %v286_v38, %v285_v37  ;;  %v298_v57 = vmul.f32 %v988_v20, %v226_v41  ;;  %v295_v59 = vmul.f32 %v966_v2, %v223_v47  ;;  %v243_v0 = vld [vmem:[%s954_s14 + $0x1e0] sm:$0xff]  ;;  %v232_v11 = vld [vmem:[%s954_s14 + $0x188] sm:$0xff]  ;;  %v246_v17 = vld [vmem:[%s954_s14 + $0x1f8] sm:$0xff] }
  0x41   : > { %v296_v60 = vmul.f32 %v968_v3, %v224_v48  ;;  %v291_v62 = vmul.f32 %v974_v8, %v219_v53  ;;  %v231_v10 = vld [vmem:[%s954_s14 + $0x180] sm:$0xff]  ;;  %v228_v15 = vld [vmem:[%s954_s14 + $0x168] sm:$0xff]  ;;  %v221_v18 = vld [vmem:[%s954_s14 + $0x130] sm:$0xff]  ;;  %v304_v27 = vmul.f32 %v968_v3, %v232_v11 }
  0x42   : > { %v382_v6 = vadd.f32 %v298_v57, %v297_v56  ;;  %v227_v12 = vld [vmem:[%s954_s14 + $0x160] sm:$0xff]  ;;  %v222_v21 = vld [vmem:[%s954_s14 + $0x138] sm:$0xff]  ;;  %v303_v26 = vmul.f32 %v966_v2, %v231_v10  ;;  %v300_v29 = vmul.f32 %v976_v9, %v228_v15  ;;  %v293_v31 = vmul.f32 %v992_v24, %v221_v18  ;;  %v236_v36 = vld [vmem:[%s954_s14 + $0x1a8] sm:$0xff] }
  0x43   : > { %v294_v32 = vmul.f32 %v994_v25, %v222_v21  ;;  %v235_v35 = vld [vmem:[%s954_s14 + $0x1a0] sm:$0xff]  ;;  %v229_v37 = vld [vmem:[%s954_s14 + $0x170] sm:$0xff]  ;;  %v308_v41 = vmul.f32 %v976_v9, %v236_v36 }
  0x44   : > { %344 = vadd.xlane.f32.xlu2 %v343_v50  ;;  %v314_v50 = vmul.f32 %v988_v20, %v242_v44  ;;  %v391_v33 = vadd.f32 %v304_v27, %v303_v26  ;;  %v233_v38 = vld [vmem:[%s954_s14 + $0x190] sm:$0xff]  ;;  %v307_v40 = vmul.f32 %v974_v8, %v235_v35 }
  0x45   : > { %v376_v2 = vadd.f32 %v294_v32, %v293_v31  ;;  %v305_v44 = vmul.f32 %v986_v19, %v233_v38  ;;  %v237_v48 = vld [vmem:[%s954_s14 + $0x1b0] sm:$0xff]  ;;  %v447_v19 = vlaneseq }
  0x46   : > { %341 = vadd.xlane.f32.xlu1 %v340_v51  ;;  %v240_v51 = vld [vmem:[%s954_s14 + $0x1c8] sm:$0xff]  ;;  %v1068_v58 = vadd.f32 %v314_v50, %v313_v49  ;;  %v238_v49 = vld [vmem:[%s954_s14 + $0x1b8] sm:$0xff] }
  0x47   : > { %338 = vadd.xlane.f32.xlu0 %v337_v54  ;;  %v220_v54 = vld [vmem:[%s954_s14 + $0x128] sm:$0xff]  ;;  %v312_v55 = vmul.f32 %v968_v3, %v240_v51  ;;  %v230_v3 = vld [vmem:[%s954_s14 + $0x178] sm:$0xff] }
  0x48   : > { %v292_v63 = vmul.f32 %v976_v9, %v220_v54  ;;  %v302_v43 = vmul.f32 %v994_v25, %v230_v3  ;;  %v1111_v54 = vand.u32 127, %v447_v19 }
  0x49   : > { %v403_v61 = vadd.f32 %v312_v55, %v311_v52 }
  0x4a   : > { %v373_v14 = vadd.f32 %v292_v63, %v291_v62  ;;  %v1114_v55 = vadd.s32 4294967288, %v1111_v54 }
  0x4c   : > { %353 = vadd.xlane.f32.xlu2 %v352_v1  ;;  %v244_v1 = vld [vmem:[%s954_s14 + $0x1e8] sm:$0xff] }
  0x4d   : > { %v316_v5 = vmul.f32 %v976_v9, %v244_v1  ;;  %v310_v9 = vmul.f32 %v994_v25, %v238_v49 }
  0x4e   : > { %350 = vadd.xlane.f32.xlu1 %v349_v4  ;;  %v315_v4 = vmul.f32 %v974_v8, %v243_v0 }
  0x4f   : > { %347 = vadd.xlane.f32.xlu0 %v346_v7  ;;  %v379_v7 = vadd.f32 %v296_v60, %v295_v59 }
  0x50   : > { %v409_v13 = vadd.f32 %v316_v5, %v315_v4 }
  0x54   : > { %362 = vadd.xlane.f32.xlu2 %v361_v22  ;;  %v317_v22 = vmul.f32 %v992_v24, %v245_v16 }
  0x56   : > { %359 = vadd.xlane.f32.xlu1 %v358_v23  ;;  %v318_v23 = vmul.f32 %v994_v25, %v246_v17  ;;  %v1120_v25 = vadd.s32 4294967280, %v1111_v54 }
  0x57   : > { %356 = vadd.xlane.f32.xlu0 %v355_v28  ;;  %v299_v28 = vmul.f32 %v974_v8, %v227_v12  ;;  %v309_v8 = vmul.f32 %v992_v24, %v237_v48 }
  0x58   : > { %v412_v30 = vadd.f32 %v318_v23, %v317_v22 }
  0x59   : > { %v385_v34 = vadd.f32 %v300_v29, %v299_v28  ;;  %v400_v51 = vadd.f32 %v310_v9, %v309_v8 }
  0x5c   : > { %371 = vadd.xlane.f32.xlu2 %v370_v39  ;;  %v234_v39 = vld [vmem:[%s954_s14 + $0x198] sm:$0xff] }
  0x5d   : > { %v306_v45 = vmul.f32 %v988_v20, %v234_v39 }
  0x5e   : > { %368 = vadd.xlane.f32.xlu1 %v367_v42  ;;  %v301_v42 = vmul.f32 %v992_v24, %v229_v37  ;;  %v1117_v24 = vadd.s32 4294967272, %v1111_v54 }
  0x5f   : > { %365 = vadd.xlane.f32.xlu0 %v364_v46  ;;  %v397_v46 = vadd.f32 %v308_v41, %v307_v40  ;;  %v394_v50 = vadd.f32 %v306_v45, %v305_v44 }
  0x60   : > { %v388_v47 = vadd.f32 %v302_v43, %v301_v42 }
  0x64   : > { %383 = vadd.xlane.f32.xlu2 %v382_v6 }
  0x66   : > { %380 = vadd.xlane.f32.xlu1 %v379_v7 }
  0x67   : > { %374 = vadd.xlane.f32.xlu0 %v373_v14 }
  0x6c   : > { %392 = vadd.xlane.f32.xlu2 %v391_v33 }
  0x6e   : > { %386 = vadd.xlane.f32.xlu1 %v385_v34 }
  0x6f   : > { %377 = vadd.xlane.f32.xlu0 %v376_v2 }
  0x74   : > { %398 = vadd.xlane.f32.xlu2 %v397_v46 }
  0x76   : > { %389 = vadd.xlane.f32.xlu1 %v388_v47 }
  0x77   : > { %395 = vadd.xlane.f32.xlu0 %v394_v50 }
  0x7c   : > { %401 = vadd.xlane.f32.xlu2 %v400_v51 }
  0x7e   : > { %407 = vadd.xlane.f32.xlu1 %v1068_v58 }
  0x7f   : > { %404 = vadd.xlane.f32.xlu0 %v403_v61 }
  0x86   : > { %413 = vadd.xlane.f32.xlu1 %v412_v30 }
  0x87   : > { %410 = vadd.xlane.f32.xlu0 %v409_v13 }
  0xa7   : > { %v333_v20 = vpop.xlane.xlu2 %332 }
  0xa8   : > { %v462_v4 = vperm.slane %v333_v20, %v1111_v54 }
  0xa9   : > { %v327_v52 = vpop.xlane.xlu1 %326 }
  0xaa   : > { %v321_v53 = vpop.xlane.xlu0 %320  ;;  %v455_v62 = vperm.slane %v327_v52, %v1120_v25 }
  0xab   : > { %v449_v59 = vperm.slane %v321_v53, %v1111_v54 }
  0xaf   : > { %v336_v56 = vpop.xlane.xlu2 %335 }
  0xb0   : > { %v463_v5 = vperm.slane %v336_v56, %v1114_v55 }
  0xb1   : > { %v330_v57 = vpop.xlane.xlu1 %329 }
  0xb2   : > { %v324_v58 = vpop.xlane.xlu0 %323  ;;  %v459_v60 = vperm.slane %v330_v57, %v1117_v24  ;;  %v464_v13 = vsel %vm452_vm0, %v463_v5, %v462_v4 }
  0xb3   : > { %v451_v61 = vperm.slane %v324_v58, %v1114_v55 }
  0xb5   : > { %v453_v63 = vsel %vm452_vm0, %v451_v61, %v449_v59 }
  0xb6   : > { %v457_v0 = vsel %vm456_vm1, %v455_v62, %v453_v63 }
  0xb7   : > { %v461_v1 = vsel %vm460_vm2, %v459_v60, %v457_v0  ;;  %v345_v6 = vpop.xlane.xlu2 %344 }
  0xb8   : > { %v469_v3 = vperm.slane %v345_v6, %v1111_v54 }
  0xb9   : > { %v342_v7 = vpop.xlane.xlu1 %341 }
  0xba   : > { %v467_v10 = vperm.slane %v342_v7, %v1117_v24  ;;  %v339_v11 = vpop.xlane.xlu0 %338 }
  0xbb   : > { %v465_v12 = vperm.slane %v339_v11, %v1120_v25 }
  0xbd   : > { %v466_v14 = vsel %vm456_vm1, %v465_v12, %v464_v13 }
  0xbe   : > { %v468_v15 = vsel %vm460_vm2, %v467_v10, %v466_v14 }
  0xbf   : > { %v512_v16 = vsel %vm511_vm3, %v468_v15, %v461_v1  ;;  %v354_v17 = vpop.xlane.xlu2 %353 }
  0xc0   : > { %v474_v43 = vperm.slane %v354_v17, %v1117_v24 }
  0xc1   : > { %v351_v18 = vpop.xlane.xlu1 %350 }
  0xc2   : > { %v348_v21 = vpop.xlane.xlu0 %347  ;;  %v472_v39 = vperm.slane %v351_v18, %v1120_v25 }
  0xc3   : > { %v470_v38 = vperm.slane %v348_v21, %v1114_v55 }
  0xc5   : > { %v471_v42 = vsel %vm452_vm0, %v470_v38, %v469_v3 }
  0xc6   : > { %v473_v45 = vsel %vm456_vm1, %v472_v39, %v471_v42 }
  0xc7   : > { %v363_v22 = vpop.xlane.xlu2 %362  ;;  %v475_v58 = vsel %vm460_vm2, %v474_v43, %v473_v45 }
  0xc8   : > { %v479_v46 = vperm.slane %v363_v22, %v1120_v25  ;;  %v514_v10 = vsel %vm513_vm4, %v475_v58, %v512_v16 }
  0xc9   : > { %v360_v23 = vpop.xlane.xlu1 %359 }
  0xca   : > { %v357_v26 = vpop.xlane.xlu0 %356  ;;  %v477_v40 = vperm.slane %v360_v23, %v1114_v55 }
  0xcb   : > { %v476_v41 = vperm.slane %v357_v26, %v1111_v54 }
  0xcd   : > { %v478_v47 = vsel %vm452_vm0, %v477_v40, %v476_v41 }
  0xce   : > { %v480_v59 = vsel %vm456_vm1, %v479_v46, %v478_v47 }
  0xcf   : > { %v372_v27 = vpop.xlane.xlu2 %371 }
  0xd0   : > { %v484_v48 = vperm.slane %v372_v27, %v1114_v55 }
  0xd1   : > { %v369_v28 = vpop.xlane.xlu1 %368 }
  0xd2   : > { %v366_v29 = vpop.xlane.xlu0 %365  ;;  %v483_v50 = vperm.slane %v369_v28, %v1111_v54 }
  0xd3   : > { %v481_v8 = vperm.slane %v366_v29, %v1117_v24 }
  0xd4   : > { %v485_v62 = vsel %vm452_vm0, %v484_v48, %v483_v50 }
  0xd5   : > { %v482_v63 = vsel %vm460_vm2, %v481_v8, %v480_v59 }
  0xd6   : > { %v516_v17 = vsel %vm515_vm5, %v482_v63, %v514_v10 }
  0xd7   : > { %v384_v30 = vpop.xlane.xlu2 %383 }
  0xd8   : > { %v491_v19 = vperm.slane %v384_v30, %v1114_v55 }
  0xd9   : > { %v381_v31 = vpop.xlane.xlu1 %380 }
  0xda   : > { %v375_v32 = vpop.xlane.xlu0 %374  ;;  %v490_v20 = vperm.slane %v381_v31, %v1111_v54 }
  0xdb   : > { %v486_v52 = vperm.slane %v375_v32, %v1120_v25 }
  0xdc   : > { %v492_v4 = vsel %vm452_vm0, %v491_v19, %v490_v20 }
  0xdd   : > { %v487_v5 = vsel %vm456_vm1, %v486_v52, %v485_v62 }
  0xdf   : > { %v393_v33 = vpop.xlane.xlu2 %392 }
  0xe0   : > { %v497_v9 = vperm.slane %v393_v33, %v1111_v54 }
  0xe1   : > { %v387_v34 = vpop.xlane.xlu1 %386 }
  0xe2   : > { %v378_v35 = vpop.xlane.xlu0 %377  ;;  %v493_v56 = vperm.slane %v387_v34, %v1120_v25 }
  0xe3   : > { %v488_v57 = vperm.slane %v378_v35, %v1117_v24 }
  0xe4   : > { %v494_v11 = vsel %vm456_vm1, %v493_v56, %v492_v4 }
  0xe5   : > { %v489_v12 = vsel %vm460_vm2, %v488_v57, %v487_v5 }
  0xe6   : > { %v518_v21 = vsel %vm517_vm6, %v489_v12, %v516_v17 }
  0xe7   : > { %v399_v2 = vpop.xlane.xlu2 %398 }
  0xe8   : > { %v500_v60 = vperm.slane %v399_v2, %v1120_v25 }
  0xe9   : > { %v390_v36 = vpop.xlane.xlu1 %389 }
  0xea   : > { %v396_v37 = vpop.xlane.xlu0 %395  ;;  %v495_v61 = vperm.slane %v390_v36, %v1117_v24 }
  0xeb   : > { %v498_v51 = vperm.slane %v396_v37, %v1114_v55 }
  0xec   : > { %v496_v14 = vsel %vm460_vm2, %v495_v61, %v494_v11 }
  0xed   : > { %v499_v0 = vsel %vm452_vm0, %v498_v51, %v497_v9  ;;  %v520_v23 = vsel %vm519_vm7, %v496_v14, %v518_v21 }
  0xee   : > { %v501_v15 = vsel %vm456_vm1, %v500_v60, %v499_v0 }
  0xef   : > { %v402_v53 = vpop.xlane.xlu2 %401 }
  0xf0   : > { %v502_v1 = vperm.slane %v402_v53, %v1117_v24 }
  0xf1   : > { %v408_v44 = vpop.xlane.xlu1 %407 }
  0xf2   : > { %v405_v49 = vpop.xlane.xlu0 %404  ;;  %v505_v6 = vperm.slane %v408_v44, %v1114_v55  ;;  %v503_v18 = vsel %vm460_vm2, %v502_v1, %v501_v15 }
  0xf3   : > { %v504_v7 = vperm.slane %v405_v49, %v1111_v54 }
  0xf5   : > { %v506_v22 = vsel %vm452_vm0, %v505_v6, %v504_v7 }
  0xf9   : > { %v414_v13 = vpop.xlane.xlu1 %413 }
  0xfa   : > { %v411_v55 = vpop.xlane.xlu0 %410  ;;  %v509_v54 = vperm.slane %v414_v13, %v1117_v24  ;;  %v522_v24 = vsel %vm521_vm8, %v503_v18, %v520_v23 }
  0xfb   : > { %v507_v16 = vperm.slane %v411_v55, %v1120_v25 }
  0xfd   : > { %v508_v26 = vsel %vm456_vm1, %v507_v16, %v506_v22 }
  0xfe   : > { %v510_v27 = vsel %vm460_vm2, %v509_v54, %v508_v26 }
  0xff   : > { %v524_v28 = vsel %vm523_vm9, %v510_v27, %v522_v24 }
 0x100   : > { %527 = vst.msk [vmem:[%s181_s8] sm:$0xff] %vm526_vm10, %v524_v28 }
 0x101   : > { %788 = shalt.err (!%p785_p10)
}
 0x102   : > { %648 = dma.vmem_to_hbm [thread:$0]  (%p920_p3), %s542_s17, 128, %s544_s18, %s529_s19  }
 0x103 PF: > { %s555_s30 = sand.u32 1, %s819_s9   ;;  %p1222_p12 = scmp.ge.s32.totalorder %s831_s12, 2 }
 0x104   : > { %s556_s6 = scalar_lea.sflag [#allocation4], %s555_s30 }
 0x105   : > { %p659_p13 = pnand %p1222_p12, %p886_p6 }
 0x107   : > { %p660_p0 = pneg %p659_p13 }
 0x109   : > { %814 = dma.done.wait (%p660_p0), %s556_s6, 128  }
 0x10a   : > { %816 = vsyncadd (%p660_p0), %s556_s6, 4294967168  ;;  %p16_p5 = scmp.ge.s32.totalorder %s904_s23, 4   ;;  %s1223_s9 = smov %s823_s10 }
 0x10b   : > { %s1224_s10 = smov %s827_s11  ;;  %s1225_s11 = smov %s916_s28 }
 0x10c   : > { %s1226_s12 = smov %s904_s23  ;;  %18 = sbr.rel (!%p16_p5) target bundleno = 6 (0x6), region = 77 }
 0x111   :  { %562 = vsyncpa [#allocation3], 1 }
 0x112   :  { %564 = vsyncpa [#allocation3 + $0x1], 1 }
 0x113   :  { %565 = vsyncpa [#allocation6], 1 }
 0x114   :  { %566 = vsyncpa [#allocation4], 1 }
 0x115   :  { %568 = vsyncpa [#allocation4 + $0x1], 1 }

</bundles_post_ra>
